<compile_context>
chip_gen: v7x
topology: tpu7x:2x2x1
jax: 0.10.0
libtpu: 0.0.40
codegen_flags: <defaults>
</compile_context>

<pallas_src>
import functools
import math

import jax
import jax.numpy as jnp
from jax import lax
from jax.experimental import pallas as pl
from jax.experimental.pallas import tpu as pltpu


# ----------------------------- activations ---------------------------------
def _apply_activation(h, name, gelu_approximate):
    name = name.lower()
    if name == "relu":
        return jnp.maximum(h, 0.0)
    if name == "silu":
        return h * jax.nn.sigmoid(h)
    if name == "selu":
        alpha = 1.6732632423543772848170429916717
        scale = 1.0507009873554804934193349852946
        return scale * jnp.where(h > 0, h, alpha * (jnp.exp(h) - 1.0))
    if name == "gelu":
        if gelu_approximate:
            # tanh-approx GELU lowers to the EUP slot (the VALU slots are the
            # binding resource for the exact-erf polynomial on v6e/v7x).
            return jax.nn.gelu(h, approximate=True)
        # exact (erf-based) GELU == torch.nn.GELU() default.
        return 0.5 * h * (1.0 + jax.lax.erf(h * (1.0 / math.sqrt(2.0))))
    if name == "solu":
        # x * softmax(x) over the per-token feature dim (packing disabled).
        return h * jax.nn.softmax(h, axis=-1)
    raise ValueError(f"Unsupported activation: {name}")


# ------------------------------- kernel -------------------------------------
def mlp_kernel(x_ref, w1_ref, b1_ref, w2_ref, b2_ref, o_ref, *,
               activation, gelu_approximate, sub_rows, mxu_bf16):
    # x_ref:  (rows, Cp)   w1_ref: (Cp, Hp)   b1_ref: (1, Hp)  [f32]
    # w2_ref: (Hp, Cp)     b2_ref: (1, Cp)    o_ref:  (rows, Cp)
    rows = x_ref.shape[0]
    n_sub = rows // sub_rows  # wrapper guarantees divisibility

    def body(s, carry):
        r0 = pl.multiple_of(s * sub_rows, sub_rows)
        xt = x_ref[pl.ds(r0, sub_rows), :]
        if mxu_bf16:
            xt = xt.astype(jnp.bfloat16)
        # Operands go to the MXU in their native dtype; accumulate in f32.
        h = jnp.dot(xt, w1_ref[...], preferred_element_type=jnp.float32)
        h = h + b1_ref[...]
        h = _apply_activation(h, activation, gelu_approximate)
        if mxu_bf16:
            h = h.astype(jnp.bfloat16)
        out = jnp.dot(h, w2_ref[...], preferred_element_type=jnp.float32)
        out = out + b2_ref[...]
        # dropout with p=0.0 is the identity.
        # TODO(synk): for p>0 training-mode dropout, build a mask in-kernel
        # with pltpu.prng_seed + pltpu.prng_random_bits.
        o_ref[pl.ds(r0, sub_rows), :] = out.astype(o_ref.dtype)
        return carry

    lax.fori_loop(0, n_sub, body, 0, unroll=True)


# --------------------------- wrapper helpers ---------------------------------
def choose_pack_factor(C, M, activation="gelu"):
    """Tokens packed per 128-lane row (lane-dense layout)."""
    act = activation.lower()
    if C >= 128 or 128 % C != 0 or act == "solu":
        return 1
    p = 128 // C           # power of two since C divides 128
    while p > 1 and M % p != 0:
        p //= 2
    return p


def pack_mlp_params(w1, b1, w2, b2, *, pack=1, mxu_bf16=False):
    """Precompute the block-diagonal packed weights ONCE at model init.

    w1: (C, 4C), b1: (4C,), w2: (4C, C), b2: (C,)  ->  (w1p, b1p, w2p, b2p)
    """
    C, H = w1.shape
    wt = jnp.bfloat16 if mxu_bf16 else jnp.float32
    if pack > 1:
        eye = jnp.eye(pack, dtype=jnp.float32)
        w1p = jnp.kron(eye, w1.astype(jnp.float32))          # (pC, pH) block-diag
        w2p = jnp.kron(eye, w2.astype(jnp.float32))          # (pH, pC) block-diag
        b1p = jnp.tile(b1.astype(jnp.float32), pack).reshape(1, pack * H)
        b2p = jnp.tile(b2.astype(jnp.float32), pack).reshape(1, pack * C)
    else:
        w1p = w1.astype(jnp.float32)
        w2p = w2.astype(jnp.float32)
        b1p = b1.astype(jnp.float32).reshape(1, H)
        b2p = b2.astype(jnp.float32).reshape(1, C)
    return w1p.astype(wt), b1p, w2p.astype(wt), b2p


def _choose_block_rows(R, target):
    """Packed-rows-per-block.  Full array if tiny, else multiple of 8."""
    if R <= 8:
        return R
    br = max(8, (min(target, R) // 8) * 8)
    # v7x shards the 'parallel' axis across 2 TCs; aim for >= 4 grid steps so
    # each core gets >= 2 pipelined iterations (restores DMA double-buffering).
    while br > 8 and -(-R // br) < 4:
        br = max(8, ((br // 2) // 8) * 8)
    # Prefer an even number of blocks so the two TCs get equal work.
    n = -(-R // br)
    if n >= 4 and n % 2 == 1:
        alt = ((-(-R // (n + 1)) + 7) // 8) * 8
        if alt >= 8 and (-(-R // alt)) % 2 == 0:
            br = alt
    return br


def _choose_sub_rows(br, requested):
    sub = min(requested, br)
    while br % sub != 0:
        sub -= 8
    return max(sub, 1)


# ------------------------------- forward -------------------------------------
def mlp_forward(x, w1p, b1p, w2p, b2p, *, activation="gelu",
                gelu_approximate=True, block_rows=1024, sub_rows=32,
                mxu_bf16=False):
    """x: (B, T, C).  (w1p, b1p, w2p, b2p) from pack_mlp_params."""
    B, T, C = x.shape
    M = B * T
    act = activation.lower()

    Cp, Hp = w1p.shape
    p = Cp // C
    assert Cp == p * C and w2p.shape == (Hp, Cp), "packed weight shape mismatch"
    assert M % p == 0, "token count must be a multiple of the pack factor"
    assert not (act == "solu" and p > 1), "SoLU requires unpacked (p=1) weights"

    # Pure row-major view: p consecutive C-rows form one 128-lane row.
    R = M // p
    xp = x.reshape(R, Cp)

    br = _choose_block_rows(R, max(1, block_rows // p))
    n_blocks = -(-R // br)                     # partial last block -> masked stores
    sub = _choose_sub_rows(br, sub_rows)

    kernel = functools.partial(
        mlp_kernel, activation=act, gelu_approximate=gelu_approximate,
        sub_rows=sub, mxu_bf16=mxu_bf16)

    # VMEM footprint: x/out tiles double-buffered + resident weights + biases.
    itemx = x.dtype.itemsize
    itemw = w1p.dtype.itemsize
    footprint = (2 * 2 * br * Cp * itemx
                 + 2 * (Cp * Hp + Hp * Cp) * itemw
                 + 2 * 2 * (Hp + Cp) * 4)
    vmem_limit = int(min(64 * 1024 * 1024, max(16 * 1024 * 1024, 2 * footprint)))

    flops = 4 * R * Cp * Hp                    # two block-diag matmuls, 2 flops/MAC
    transcendentals = 0 if act == "relu" else R * Hp
    bytes_accessed = int(2 * R * Cp * itemx
                         + (Cp * Hp + Hp * Cp) * itemw
                         + (Hp + Cp) * 4)

    # NOTE: x/out tiles are double-buffered by default; if profiling shows
    # exposed DMA at large br, add pipeline_mode=pl.Buffered(3) to those specs.
    outp = pl.pallas_call(
        kernel,
        out_shape=jax.ShapeDtypeStruct((R, Cp), x.dtype),
        grid_spec=pltpu.PrefetchScalarGridSpec(
            num_scalar_prefetch=0,
            grid=(n_blocks,),
            in_specs=[
                pl.BlockSpec((br, Cp), lambda i: (i, 0)),  # x tile (lane-dense)
                pl.BlockSpec((Cp, Hp), lambda i: (0, 0)),  # W1 (resident)
                pl.BlockSpec((1, Hp), lambda i: (0, 0)),   # b1
                pl.BlockSpec((Hp, Cp), lambda i: (0, 0)),  # W2 (resident)
                pl.BlockSpec((1, Cp), lambda i: (0, 0)),   # b2
            ],
            out_specs=pl.BlockSpec((br, Cp), lambda i: (i, 0)),
        ),
        compiler_params=pltpu.CompilerParams(
            dimension_semantics=("parallel",),
            vmem_limit_bytes=vmem_limit,
        ),
        cost_estimate=pl.CostEstimate(
            flops=flops, transcendentals=transcendentals,
            bytes_accessed=bytes_accessed),
    )(xp, w1p, b1p, w2p, b2p)

    return outp.reshape(B, T, C)


# --------------------------- pure-JAX reference ------------------------------
def mlp_reference(x, w1, b1, w2, b2, activation="gelu", gelu_approximate=False):
    h = (jnp.einsum("btc,ch->bth", x.astype(jnp.float32), w1.astype(jnp.float32))
         + b1.astype(jnp.float32))
    h = _apply_activation(h, activation, gelu_approximate)
    out = (jnp.einsum("bth,hc->btc", h, w2.astype(jnp.float32))
           + b2.astype(jnp.float32))
    return out.astype(x.dtype)


# --------------------------------- main --------------------------------------
if __name__ == "__main__":
    # Small GPT-like config
    B, T, C = 2, 8, 32
    H = 4 * C  # 128

    key = jax.random.PRNGKey(0)
    kx, k1, kb1, k2, kb2 = jax.random.split(key, 5)

    x = jax.random.normal(kx, (B, T, C), dtype=jnp.float32)

    # PyTorch nn.Linear stores weight as (out, in); init uniform(-1/sqrt(in), 1/sqrt(in)).
    lim1 = 1.0 / math.sqrt(C)
    w1_torch = jax.random.uniform(k1, (H, C), minval=-lim1, maxval=lim1, dtype=jnp.float32)
    b1 = jax.random.uniform(kb1, (H,), minval=-lim1, maxval=lim1, dtype=jnp.float32)

    lim2 = 1.0 / math.sqrt(H)
    w2_torch = jax.random.uniform(k2, (C, H), minval=-lim2, maxval=lim2, dtype=jnp.float32)
    b2 = jax.random.uniform(kb2, (C,), minval=-lim2, maxval=lim2, dtype=jnp.float32)

    # Pre-transpose to (in, out) for the kernel's row-major matmuls.
    w1 = w1_torch.T  # (C, H)
    w2 = w2_torch.T  # (H, C)

    # Weight packing is done ONCE here (hoisted out of the forward pass).
    M = B * T
    p = choose_pack_factor(C, M, "gelu")
    params = pack_mlp_params(w1, b1, w2, b2, pack=p, mxu_bf16=False)
    params = tuple(jax.block_until_ready(a) for a in params)

    # Default / perf path: tanh-approx GELU (EUP), f32 MXU operands.
    fwd = jax.jit(functools.partial(
        mlp_forward, activation="gelu", gelu_approximate=True, mxu_bf16=False))
    out = jax.block_until_ready(fwd(x, *params))
    assert out.shape == (B, T, C)

    ref_tanh = mlp_reference(x, w1, b1, w2, b2, "gelu", gelu_approximate=True)
    ref_erf = mlp_reference(x, w1, b1, w2, b2, "gelu", gelu_approximate=False)
    assert jnp.allclose(out, ref_tanh, atol=1e-5, rtol=1e-5), "mismatch vs tanh-GELU reference"
    # tanh-approx stays within ~3e-3 of torch's exact-erf default at these scales.
    assert jnp.allclose(out, ref_erf, atol=5e-3, rtol=5e-3), "too far from exact-GELU reference"

    # Exact-erf parity path (bit-matches torch nn.GELU() semantics).
    fwd_exact = jax.jit(functools.partial(
        mlp_forward, activation="gelu", gelu_approximate=False, mxu_bf16=False))
    out_exact = jax.block_until_ready(fwd_exact(x, *params))
    assert jnp.allclose(out_exact, ref_erf, atol=1e-5, rtol=1e-5), "mismatch vs exact-GELU reference"

    print("KERNEL_OK")
</pallas_src>

<mosaic_0001>
module attributes {stable_mosaic.version = 11 : i64} {
  func.func @mlp_kernel(%arg0: i32, %arg1: memref<4x128xf32, #tpu.memory_space<vmem>>, %arg2: memref<128x512xf32, #tpu.memory_space<vmem>>, %arg3: memref<1x512xf32, #tpu.memory_space<vmem>>, %arg4: memref<512x128xf32, #tpu.memory_space<vmem>>, %arg5: memref<1x128xf32, #tpu.memory_space<vmem>>, %arg6: memref<4x128xf32, #tpu.memory_space<vmem>>) attributes {dimension_semantics = [#tpu.dimension_semantics<parallel>], iteration_bounds = array<i64: 1>, scalar_prefetch = 0 : i64, scratch_operands = 0 : i64, tpu.core_type = #tpu.core_type<tc>, window_params = [{transform_indices = @transform_0, window_bounds = array<i64: 4, 128>}, {pipeline_mode = #tpu.pipeline_mode<synchronous>, transform_indices = @transform_1, window_bounds = array<i64: 128, 512>}, {pipeline_mode = #tpu.pipeline_mode<synchronous>, transform_indices = @transform_2, window_bounds = array<i64: 1, 512>}, {pipeline_mode = #tpu.pipeline_mode<synchronous>, transform_indices = @transform_3, window_bounds = array<i64: 512, 128>}, {pipeline_mode = #tpu.pipeline_mode<synchronous>, transform_indices = @transform_4, window_bounds = array<i64: 1, 128>}, {transform_indices = @transform_5, window_bounds = array<i64: 4, 128>}]} {
    %c0_i32 = arith.constant 0 : i32
    %c4_i32 = arith.constant 4 : i32
    %0 = arith.muli %c0_i32, %c4_i32 : i32
    %1 = tpu.assume_multiple %0, 4 : i32
    %2 = arith.index_cast %1 : i32 to index
    %c0 = arith.constant 0 : index
    %3 = vector.load %arg1[%2, %c0] : memref<4x128xf32, #tpu.memory_space<vmem>>, vector<4x128xf32>
    %c0_0 = arith.constant 0 : index
    %c0_1 = arith.constant 0 : index
    %4 = vector.load %arg2[%c0_0, %c0_1] : memref<128x512xf32, #tpu.memory_space<vmem>>, vector<128x512xf32>
    %cst = arith.constant dense<0.000000e+00> : vector<4x512xf32>
    %5 = tpu.matmul %3, %4, %cst {dimension_numbers = #tpu.dot_dimension_numbers<[1], [0], [0], [1], [0, 0, 1, 1], [], []>} : vector<4x128xf32>, vector<128x512xf32>, vector<4x512xf32> -> vector<4x512xf32>
    %c0_2 = arith.constant 0 : index
    %c0_3 = arith.constant 0 : index
    %6 = vector.load %arg3[%c0_2, %c0_3] : memref<1x512xf32, #tpu.memory_space<vmem>>, vector<1x512xf32>
    %7 = vector.broadcast %6 : vector<1x512xf32> to vector<4x512xf32>
    %8 = arith.addf %5, %7 : vector<4x512xf32>
    %9 = arith.mulf %8, %8 : vector<4x512xf32>
    %10 = arith.mulf %8, %9 : vector<4x512xf32>
    %cst_4 = arith.constant 4.471500e-02 : f32
    %11 = vector.broadcast %cst_4 : f32 to vector<4x512xf32>
    %12 = arith.mulf %11, %10 : vector<4x512xf32>
    %13 = arith.addf %8, %12 : vector<4x512xf32>
    %cst_5 = arith.constant 0.797884583 : f32
    %14 = vector.broadcast %cst_5 : f32 to vector<4x512xf32>
    %15 = arith.mulf %14, %13 : vector<4x512xf32>
    %16 = math.tanh %15 : vector<4x512xf32>
    %cst_6 = arith.constant 1.000000e+00 : f32
    %17 = vector.broadcast %cst_6 : f32 to vector<4x512xf32>
    %18 = arith.addf %17, %16 : vector<4x512xf32>
    %cst_7 = arith.constant 5.000000e-01 : f32
    %19 = vector.broadcast %cst_7 : f32 to vector<4x512xf32>
    %20 = arith.mulf %19, %18 : vector<4x512xf32>
    %21 = arith.mulf %8, %20 : vector<4x512xf32>
    %c0_8 = arith.constant 0 : index
    %c0_9 = arith.constant 0 : index
    %22 = vector.load %arg4[%c0_8, %c0_9] : memref<512x128xf32, #tpu.memory_space<vmem>>, vector<512x128xf32>
    %cst_10 = arith.constant dense<0.000000e+00> : vector<4x128xf32>
    %23 = tpu.matmul %21, %22, %cst_10 {dimension_numbers = #tpu.dot_dimension_numbers<[1], [0], [0], [1], [0, 0, 1, 1], [], []>} : vector<4x512xf32>, vector<512x128xf32>, vector<4x128xf32> -> vector<4x128xf32>
    %c0_11 = arith.constant 0 : index
    %c0_12 = arith.constant 0 : index
    %24 = vector.load %arg5[%c0_11, %c0_12] : memref<1x128xf32, #tpu.memory_space<vmem>>, vector<1x128xf32>
    %25 = vector.broadcast %24 : vector<1x128xf32> to vector<4x128xf32>
    %26 = arith.addf %23, %25 : vector<4x128xf32>
    %27 = arith.index_cast %1 : i32 to index
    %c0_13 = arith.constant 0 : index
    %28 = vector.load %arg6[%27, %c0_13] : memref<4x128xf32, #tpu.memory_space<vmem>>, vector<4x128xf32>
    tpu.vector_store %arg6[%27, %c0_13], %26 {strides = array<i32>} : memref<4x128xf32, #tpu.memory_space<vmem>>, vector<4x128xf32>,
    %c1_i32 = arith.constant 1 : i32
    return
  }
  func.func @transform_0(%arg0: i32) -> (i32, i32) {
    %c0_i32 = arith.constant 0 : i32
    %c0_i32_0 = arith.constant 0 : i32
    return %arg0, %c0_i32 : i32, i32
  }
  func.func @transform_1(%arg0: i32) -> (i32, i32) {
    %c0_i32 = arith.constant 0 : i32
    %c0_i32_0 = arith.constant 0 : i32
    %c0_i32_1 = arith.constant 0 : i32
    return %c0_i32, %c0_i32_0 : i32, i32
  }
  func.func @transform_2(%arg0: i32) -> (i32, i32) {
    %c0_i32 = arith.constant 0 : i32
    %c0_i32_0 = arith.constant 0 : i32
    %c0_i32_1 = arith.constant 0 : i32
    return %c0_i32, %c0_i32_0 : i32, i32
  }
  func.func @transform_3(%arg0: i32) -> (i32, i32) {
    %c0_i32 = arith.constant 0 : i32
    %c0_i32_0 = arith.constant 0 : i32
    %c0_i32_1 = arith.constant 0 : i32
    return %c0_i32, %c0_i32_0 : i32, i32
  }
  func.func @transform_4(%arg0: i32) -> (i32, i32) {
    %c0_i32 = arith.constant 0 : i32
    %c0_i32_0 = arith.constant 0 : i32
    %c0_i32_1 = arith.constant 0 : i32
    return %c0_i32, %c0_i32_0 : i32, i32
  }
  func.func @transform_5(%arg0: i32) -> (i32, i32) {
    %c0_i32 = arith.constant 0 : i32
    %c0_i32_0 = arith.constant 0 : i32
    return %arg0, %c0_i32 : i32, i32
  }
}

</mosaic_0001>

<bundles_post_ra>
// kernel: mlp_forward.1
= control target key start
LH: loop header
LB: loop body
LE: loop exit
PB: predicated region body
PF: predicated region fallthrough
CT: control target
= control target key end

     0   :  { %10 = vsyncpa [#allocation3], 0  ;;  %s866_s0 = inlined_call_operand.vmem [shape: f32[4,128], index: 0, kind: input, shape index: {}]   ;;  %s867_s1 = inlined_call_operand.hbm [shape: f32[128,512], index: 1, kind: input, shape index: {}]   ;;  %s868_s2 = inlined_call_operand.vmem [shape: f32[1,512], index: 2, kind: input, shape index: {}]   ;;  %s869_s3 = inlined_call_operand.hbm [shape: f32[512,128], index: 3, kind: input, shape index: {}]   ;;  %s870_s4 = inlined_call_operand.vmem [shape: f32[1,128], index: 4, kind: input, shape index: {}]   ;;  %s871_s5 = inlined_call_operand.vmem [shape: f32[4,128], index: 5, kind: output, shape index: {}]  }
   0x1   :  { %11 = vsyncpa [#allocation5], 0  ;;  %s793_s18 = smov [#allocation2]   ;;  %s745_s22 = scalar_lea.hbm %s867_s1, 8192 }
   0x2   :  { %s19_s19 = sshll.u32 %s793_s18, 4  ;;  %p746_p0 = scmp.ne.s32.totalorder %s867_s1, %s745_s22  ;;  %s20_s19 = int_to_ptr.vmem [resolvable:$true] %s19_s19 }
   0x3   :  { %p749_p1 = scmp.lt.u32.totalorder %s745_s22, %s867_s1 }
   0x5   :  { %p751_p2 = pnand %p749_p1, %p746_p0 }
   0x7   :  { %754 = shalt.err (!%p751_p2)
}
   0x8   :  { %s755_s27 = scalar_lea.vmem %s20_s19, 8192  ;;  %p760_p4 = scmp.lt.s32.totalorder %s20_s19, %s20_s19 }
   0x9   :  { %p756_p3 = scmp.ne.s32.totalorder %s20_s19, %s755_s27  ;;  %p761_p5 = scmp.lt.s32.totalorder %s755_s27, %s755_s27 }
   0xb   :  { %p762_p6 = por %p761_p5, %p760_p4 }
   0xd   :  { %p763_p7 = pnand %p762_p6, %p756_p3 }
   0xf   :  { %766 = shalt.err (!%p763_p7)
}
  0x10   :  { %s794_s28 = smov 512   ;;  %s795_s29 = smov 32  }
  0x11   :  { %25 = dma.hbm_to_vmem [thread:$0]  %s867_s1, 8192, %s20_s19, [#allocation3], %s794_s28, %s794_s28, %s795_s29  }
  0x12   :  { %s796_s7 = smov [#allocation4]   ;;  %s767_s11 = scalar_lea.hbm %s869_s3, 8192 }
  0x13   :  { %s33_s8 = sshll.u32 %s796_s7, 4  ;;  %p768_p8 = scmp.ne.s32.totalorder %s869_s3, %s767_s11  ;;  %s34_s8 = int_to_ptr.vmem [resolvable:$true] %s33_s8 }
  0x14   :  { %p771_p9 = scmp.lt.u32.totalorder %s767_s11, %s869_s3 }
  0x16   :  { %p773_p10 = pnand %p771_p9, %p768_p8 }
  0x18   :  { %776 = shalt.err (!%p773_p10)
}
  0x19   :  { %s777_s16 = scalar_lea.vmem %s34_s8, 8192  ;;  %p782_p12 = scmp.lt.s32.totalorder %s34_s8, %s34_s8 }
  0x1a   :  { %p778_p11 = scmp.ne.s32.totalorder %s34_s8, %s777_s16  ;;  %p783_p13 = scmp.lt.s32.totalorder %s777_s16, %s777_s16 }
  0x1c   :  { %p784_p0 = por %p783_p13, %p782_p12 }
  0x1e   :  { %p785_p1 = pnand %p784_p0, %p778_p11 }
  0x20   :  { %788 = shalt.err (!%p785_p1)
}
  0x21   :  { %s797_s1 = smov 128   ;;  %s798_s17 = smov 8  }
  0x22   :  { %39 = dma.hbm_to_vmem [thread:$0]  %s869_s3, 8192, %s34_s8, [#allocation5], %s797_s1, %s797_s1, %s798_s17  }
  0x23   :  { %789 = dma.done.wait [#allocation3], 8192  }
  0x24   :  { %790 = vsyncadd [#allocation3], 4294959104 }
  0x25   :  { %791 = dma.done.wait [#allocation5], 8192  }
  0x26   :  { %792 = vsyncadd [#allocation5], 4294959104  ;;  %v799_v0 = vmov 0.0   ;;  %v50_v1 = vld [vmem:[#allocation2 + $0x8] sm:$0xff]  ;;  %v52_v3 = vld [vmem:[#allocation2 + $0x18] sm:$0xff] }
  0x27   :  { %199 = vmatprep.mubr.f32.mxu0 %v799_v0  ;;  %270 = vmatprep.mubr.f32.mxu1 %v799_v0  ;;  %v54_v2 = vld [vmem:[#allocation2 + $0x28] sm:$0xff]  ;;  %v56_v5 = vld [vmem:[#allocation2 + $0x38] sm:$0xff]  ;;  %v49_v6 = vld [vmem:[#allocation2] sm:$0xff] }
  0x28   :  { %v602_v4 = vpack.c.bf16 %v54_v2, %v50_v1  ;;  %v53_v7 = vld [vmem:[#allocation2 + $0x20] sm:$0xff]  ;;  %v634_v8 = vpack.c.bf16 %v56_v5, %v52_v3  ;;  %v51_v10 = vld [vmem:[#allocation2 + $0x10] sm:$0xff]  ;;  %v58_v12 = vld [vmem:[#allocation2 + $0x48] sm:$0xff] }
  0x29   :  { %v604_v9 = vpack.c.bf16 %v53_v7, %v49_v6  ;;  %v55_v11 = vld [vmem:[#allocation2 + $0x30] sm:$0xff]  ;;  %v62_v14 = vld [vmem:[#allocation2 + $0x68] sm:$0xff]  ;;  %v60_v15 = vld [vmem:[#allocation2 + $0x58] sm:$0xff] }
  0x2a   :  { %603 = vmatprep.subr.bf16.mxu0 %v602_v4  ;;  %v636_v13 = vpack.c.bf16 %v55_v11, %v51_v10  ;;  %v64_v16 = vld [vmem:[#allocation2 + $0x78] sm:$0xff]  ;;  %635 = vmatprep.subr.bf16.mxu1 %v634_v8  ;;  %v606_v17 = vpack.c.bf16 %v62_v14, %v58_v12  ;;  %v57_v19 = vld [vmem:[#allocation2 + $0x40] sm:$0xff]  ;;  %v59_v21 = vld [vmem:[#allocation2 + $0x50] sm:$0xff] }
  0x2b   :  { %605 = vmatpush1.bf16.msra.mxu0 %v604_v9  ;;  %v638_v18 = vpack.c.bf16 %v64_v16, %v60_v15  ;;  %v61_v20 = vld [vmem:[#allocation2 + $0x60] sm:$0xff]  ;;  %v63_v23 = vld [vmem:[#allocation2 + $0x70] sm:$0xff]  ;;  %v66_v24 = vld [vmem:[#allocation2 + $0x88] sm:$0xff] }
  0x2c   :  { %637 = vmatpush1.bf16.msra.mxu1 %v636_v13  ;;  %v608_v22 = vpack.c.bf16 %v61_v20, %v57_v19  ;;  %v70_v25 = vld [vmem:[#allocation2 + $0xa8] sm:$0xff]  ;;  %607 = vmatprep.subr.bf16.mxu0 %v606_v17  ;;  %v640_v26 = vpack.c.bf16 %v63_v23, %v59_v21  ;;  %v68_v28 = vld [vmem:[#allocation2 + $0x98] sm:$0xff]  ;;  %v65_v30 = vld [vmem:[#allocation2 + $0x80] sm:$0xff] }
  0x2d   :  { %639 = vmatprep.subr.bf16.mxu1 %v638_v18  ;;  %v610_v27 = vpack.c.bf16 %v70_v25, %v66_v24  ;;  %v72_v29 = vld [vmem:[#allocation2 + $0xb8] sm:$0xff]  ;;  %v69_v32 = vld [vmem:[#allocation2 + $0xa0] sm:$0xff]  ;;  %v67_v33 = vld [vmem:[#allocation2 + $0x90] sm:$0xff] }
  0x2e   :  { %v642_v31 = vpack.c.bf16 %v72_v29, %v68_v28  ;;  %v71_v34 = vld [vmem:[#allocation2 + $0xb0] sm:$0xff]  ;;  %v612_v35 = vpack.c.bf16 %v69_v32, %v65_v30  ;;  %v74_v36 = vld [vmem:[#allocation2 + $0xc8] sm:$0xff]  ;;  %v76_v38 = vld [vmem:[#allocation2 + $0xd8] sm:$0xff] }
  0x2f   :  { %609 = vmatpush1.bf16.msra.mxu0 %v608_v22  ;;  %v78_v37 = vld [vmem:[#allocation2 + $0xe8] sm:$0xff]  ;;  %v644_v39 = vpack.c.bf16 %v71_v34, %v67_v33  ;;  %v80_v41 = vld [vmem:[#allocation2 + $0xf8] sm:$0xff]  ;;  %v73_v42 = vld [vmem:[#allocation2 + $0xc0] sm:$0xff] }
  0x30   :  { %641 = vmatpush1.bf16.msra.mxu1 %v640_v26  ;;  %611 = vmatprep.subr.bf16.mxu0 %v610_v27  ;;  %v614_v40 = vpack.c.bf16 %v78_v37, %v74_v36  ;;  %v77_v43 = vld [vmem:[#allocation2 + $0xe0] sm:$0xff]  ;;  %v646_v44 = vpack.c.bf16 %v80_v41, %v76_v38  ;;  %v75_v45 = vld [vmem:[#allocation2 + $0xd0] sm:$0xff]  ;;  %v82_v47 = vld [vmem:[#allocation2 + $0x108] sm:$0xff] }
  0x31   :  { %643 = vmatprep.subr.bf16.mxu1 %v642_v31  ;;  %v79_v46 = vld [vmem:[#allocation2 + $0xf0] sm:$0xff]  ;;  %v86_v48 = vld [vmem:[#allocation2 + $0x128] sm:$0xff]  ;;  %v84_v49 = vld [vmem:[#allocation2 + $0x118] sm:$0xff]  ;;  %v616_v51 = vpack.c.bf16 %v77_v43, %v73_v42 }
  0x32   :  { %v88_v50 = vld [vmem:[#allocation2 + $0x138] sm:$0xff]  ;;  %v648_v52 = vpack.c.bf16 %v79_v46, %v75_v45  ;;  %v618_v53 = vpack.c.bf16 %v86_v48, %v82_v47  ;;  %v81_v54 = vld [vmem:[#allocation2 + $0x100] sm:$0xff]  ;;  %v83_v56 = vld [vmem:[#allocation2 + $0x110] sm:$0xff] }
  0x33   :  { %613 = vmatpush1.bf16.msra.mxu0 %v612_v35  ;;  %v85_v55 = vld [vmem:[#allocation2 + $0x120] sm:$0xff]  ;;  %v650_v57 = vpack.c.bf16 %v88_v50, %v84_v49  ;;  %v87_v58 = vld [vmem:[#allocation2 + $0x130] sm:$0xff]  ;;  %v90_v59 = vld [vmem:[#allocation2 + $0x148] sm:$0xff] }
  0x34   :  { %645 = vmatpush1.bf16.msra.mxu1 %v644_v39  ;;  %615 = vmatprep.subr.bf16.mxu0 %v614_v40  ;;  %v94_v60 = vld [vmem:[#allocation2 + $0x168] sm:$0xff]  ;;  %v92_v61 = vld [vmem:[#allocation2 + $0x158] sm:$0xff]  ;;  %v620_v63 = vpack.c.bf16 %v85_v55, %v81_v54  ;;  %v652_v0 = vpack.c.bf16 %v87_v58, %v83_v56  ;;  %v89_v2 = vld [vmem:[#allocation2 + $0x140] sm:$0xff] }
  0x35   :  { %647 = vmatprep.subr.bf16.mxu1 %v646_v44  ;;  %v96_v62 = vld [vmem:[#allocation2 + $0x178] sm:$0xff]  ;;  %v622_v1 = vpack.c.bf16 %v94_v60, %v90_v59  ;;  %v93_v3 = vld [vmem:[#allocation2 + $0x160] sm:$0xff]  ;;  %v91_v4 = vld [vmem:[#allocation2 + $0x150] sm:$0xff] }
  0x36   :  { %v654_v5 = vpack.c.bf16 %v96_v62, %v92_v61  ;;  %v95_v6 = vld [vmem:[#allocation2 + $0x170] sm:$0xff]  ;;  %v98_v7 = vld [vmem:[#allocation2 + $0x188] sm:$0xff]  ;;  %v100_v9 = vld [vmem:[#allocation2 + $0x198] sm:$0xff]  ;;  %v624_v11 = vpack.c.bf16 %v93_v3, %v89_v2 }
  0x37   :  { %617 = vmatpush1.bf16.msra.mxu0 %v616_v51  ;;  %v102_v8 = vld [vmem:[#allocation2 + $0x1a8] sm:$0xff]  ;;  %v104_v10 = vld [vmem:[#allocation2 + $0x1b8] sm:$0xff]  ;;  %v656_v12 = vpack.c.bf16 %v95_v6, %v91_v4  ;;  %v97_v14 = vld [vmem:[#allocation2 + $0x180] sm:$0xff] }
  0x38   :  { %649 = vmatpush1.bf16.msra.mxu1 %v648_v52  ;;  %619 = vmatprep.subr.bf16.mxu0 %v618_v53  ;;  %v626_v13 = vpack.c.bf16 %v102_v8, %v98_v7  ;;  %v101_v15 = vld [vmem:[#allocation2 + $0x1a0] sm:$0xff]  ;;  %v99_v16 = vld [vmem:[#allocation2 + $0x190] sm:$0xff]  ;;  %v658_v17 = vpack.c.bf16 %v104_v10, %v100_v9  ;;  %v106_v19 = vld [vmem:[#allocation2 + $0x1c8] sm:$0xff] }
  0x39   :  { %651 = vmatprep.subr.bf16.mxu1 %v650_v57  ;;  %v103_v18 = vld [vmem:[#allocation2 + $0x1b0] sm:$0xff]  ;;  %v110_v20 = vld [vmem:[#allocation2 + $0x1e8] sm:$0xff]  ;;  %v108_v21 = vld [vmem:[#allocation2 + $0x1d8] sm:$0xff]  ;;  %v628_v23 = vpack.c.bf16 %v101_v15, %v97_v14 }
  0x3a   :  { %v112_v22 = vld [vmem:[#allocation2 + $0x1f8] sm:$0xff]  ;;  %v660_v24 = vpack.c.bf16 %v103_v18, %v99_v16  ;;  %v630_v25 = vpack.c.bf16 %v110_v20, %v106_v19  ;;  %v105_v26 = vld [vmem:[#allocation2 + $0x1c0] sm:$0xff]  ;;  %v107_v29 = vld [vmem:[#allocation2 + $0x1d0] sm:$0xff] }
  0x3b   :  { %621 = vmatpush1.bf16.msra.mxu0 %v620_v63  ;;  %v109_v27 = vld [vmem:[#allocation2 + $0x1e0] sm:$0xff]  ;;  %v662_v28 = vpack.c.bf16 %v112_v22, %v108_v21  ;;  %v111_v30 = vld [vmem:[#allocation2 + $0x1f0] sm:$0xff]  ;;  %v330_v35 = vld [vmem:[#allocation4 + $0x88] sm:$0xff] }
  0x3c   :  { %653 = vmatpush1.bf16.msra.mxu1 %v652_v0  ;;  %623 = vmatprep.subr.bf16.mxu0 %v622_v1  ;;  %v632_v31 = vpack.c.bf16 %v109_v27, %v105_v26  ;;  %v664_v32 = vpack.c.bf16 %v111_v30, %v107_v29  ;;  %v48_v33 = vld [vmem:[%s866_s0] sm:$0xf]  ;;  %v362_v38 = vld [vmem:[#allocation4 + $0x188] sm:$0xff]  ;;  %v331_v46 = vld [vmem:[#allocation4 + $0x90] sm:$0xff] }
  0x3d   :  { %655 = vmatprep.subr.bf16.mxu1 %v654_v5  ;;  %v329_v34 = vld [vmem:[#allocation4 + $0x80] sm:$0xff]  ;;  %v314_v40 = vld [vmem:[#allocation4 + $0x8] sm:$0xff]  ;;  %v332_v47 = vld [vmem:[#allocation4 + $0x98] sm:$0xff] }
  0x3e   :  { %v361_v36 = vld [vmem:[#allocation4 + $0x180] sm:$0xff]  ;;  %v666_v37 = vpack.c.bf16 %v330_v35, %v329_v34  ;;  %v346_v44 = vld [vmem:[#allocation4 + $0x108] sm:$0xff]  ;;  %v363_v48 = vld [vmem:[#allocation4 + $0x190] sm:$0xff]  ;;  %v670_v49 = vpack.c.bf16 %v332_v47, %v331_v46 }
  0x3f   :  { %625 = vmatpush1.bf16.msra.mxu0 %v624_v11  ;;  %v313_v39 = vld [vmem:[#allocation4] sm:$0xff]  ;;  %v698_v41 = vpack.c.bf16 %v362_v38, %v361_v36  ;;  %v364_v50 = vld [vmem:[#allocation4 + $0x198] sm:$0xff]  ;;  %v315_v51 = vld [vmem:[#allocation4 + $0x10] sm:$0xff] }
  0x40   :  { %657 = vmatpush1.bf16.msra.mxu1 %v656_v12  ;;  %627 = vmatprep.subr.bf16.mxu0 %v626_v13  ;;  %v668_v42 = vpack.c.bf16 %v314_v40, %v313_v39  ;;  %v345_v43 = vld [vmem:[#allocation4 + $0x100] sm:$0xff]  ;;  %v316_v52 = vld [vmem:[#allocation4 + $0x18] sm:$0xff]  ;;  %v702_v53 = vpack.c.bf16 %v364_v50, %v363_v48  ;;  %v347_v55 = vld [vmem:[#allocation4 + $0x110] sm:$0xff] }
  0x41   :  { %659 = vmatprep.subr.bf16.mxu1 %v658_v17  ;;  %v700_v45 = vpack.c.bf16 %v346_v44, %v345_v43  ;;  %v672_v54 = vpack.c.bf16 %v316_v52, %v315_v51  ;;  %v348_v56 = vld [vmem:[#allocation4 + $0x118] sm:$0xff]  ;;  %v333_v58 = vld [vmem:[#allocation4 + $0xa0] sm:$0xff]  ;;  %v334_v59 = vld [vmem:[#allocation4 + $0xa8] sm:$0xff] }
  0x42   :  { %v704_v57 = vpack.c.bf16 %v348_v56, %v347_v55  ;;  %v365_v60 = vld [vmem:[#allocation4 + $0x1a0] sm:$0xff]  ;;  %v674_v61 = vpack.c.bf16 %v334_v59, %v333_v58  ;;  %v366_v62 = vld [vmem:[#allocation4 + $0x1a8] sm:$0xff]  ;;  %v335_v6 = vld [vmem:[#allocation4 + $0xb0] sm:$0xff] }
  0x43   :  { %629 = vmatpush1.bf16.msra.mxu0 %v628_v23  ;;  %v317_v63 = vld [vmem:[#allocation4 + $0x20] sm:$0xff]  ;;  %v318_v0 = vld [vmem:[#allocation4 + $0x28] sm:$0xff]  ;;  %v706_v1 = vpack.c.bf16 %v366_v62, %v365_v60  ;;  %v336_v7 = vld [vmem:[#allocation4 + $0xb8] sm:$0xff] }
  0x44   :  { %661 = vmatpush1.bf16.msra.mxu1 %v660_v24  ;;  %631 = vmatprep.subr.bf16.mxu0 %v630_v25  ;;  %v676_v2 = vpack.c.bf16 %v318_v0, %v317_v63  ;;  %v349_v3 = vld [vmem:[#allocation4 + $0x120] sm:$0xff]  ;;  %v350_v4 = vld [vmem:[#allocation4 + $0x128] sm:$0xff]  ;;  %v367_v8 = vld [vmem:[#allocation4 + $0x1b0] sm:$0xff]  ;;  %v678_v9 = vpack.c.bf16 %v336_v7, %v335_v6 }
  0x45   :  { %663 = vmatprep.subr.bf16.mxu1 %v662_v28  ;;  %v708_v5 = vpack.c.bf16 %v350_v4, %v349_v3  ;;  %v368_v10 = vld [vmem:[#allocation4 + $0x1b8] sm:$0xff]  ;;  %v319_v11 = vld [vmem:[#allocation4 + $0x30] sm:$0xff]  ;;  %v337_v18 = vld [vmem:[#allocation4 + $0xc0] sm:$0xff] }
  0x46   :  { %v320_v12 = vld [vmem:[#allocation4 + $0x38] sm:$0xff]  ;;  %v710_v13 = vpack.c.bf16 %v368_v10, %v367_v8  ;;  %v351_v15 = vld [vmem:[#allocation4 + $0x130] sm:$0xff]  ;;  %v338_v19 = vld [vmem:[#allocation4 + $0xc8] sm:$0xff] }
  0x47   :  { %633 = vmatpush1.bf16.msra.mxu0 %v632_v31  ;;  %v680_v14 = vpack.c.bf16 %v320_v12, %v319_v11  ;;  %v352_v16 = vld [vmem:[#allocation4 + $0x138] sm:$0xff]  ;;  %v369_v20 = vld [vmem:[#allocation4 + $0x1c0] sm:$0xff]  ;;  %v682_v21 = vpack.c.bf16 %v338_v19, %v337_v18  ;;  %v370_v22 = vld [vmem:[#allocation4 + $0x1c8] sm:$0xff] }
  0x48   :  { %665 = vmatpush1.bf16.msra.mxu1 %v664_v32  ;;  %667 = vmatprep.subr.bf16.mxu0 %v666_v37  ;;  %v712_v17 = vpack.c.bf16 %v352_v16, %v351_v15  ;;  %v321_v23 = vld [vmem:[#allocation4 + $0x40] sm:$0xff]  ;;  %v322_v24 = vld [vmem:[#allocation4 + $0x48] sm:$0xff]  ;;  %v714_v25 = vpack.c.bf16 %v370_v22, %v369_v20  ;;  %v339_v29 = vld [vmem:[#allocation4 + $0xd0] sm:$0xff] }
  0x49   :  { %699 = vmatprep.subr.bf16.mxu1 %v698_v41  ;;  %v684_v26 = vpack.c.bf16 %v322_v24, %v321_v23  ;;  %v353_v27 = vld [vmem:[#allocation4 + $0x140] sm:$0xff]  ;;  %v354_v28 = vld [vmem:[#allocation4 + $0x148] sm:$0xff]  ;;  %v340_v31 = vld [vmem:[#allocation4 + $0xd8] sm:$0xff] }
  0x4a   :  { %200 = vmatmul.mubr.f32.vlgmr.msra.gmra.mrb[0].mxu0 %v48_v33  ;;  %v716_v30 = vpack.c.bf16 %v354_v28, %v353_v27  ;;  %v371_v32 = vld [vmem:[#allocation4 + $0x1d0] sm:$0xff]  ;;  %v686_v34 = vpack.c.bf16 %v340_v31, %v339_v29  ;;  %v324_v37 = vld [vmem:[#allocation4 + $0x58] sm:$0xff]  ;;  %v341_v41 = vld [vmem:[#allocation4 + $0xe0] sm:$0xff] }
  0x4b   :  { %271 = vmatmul.mubr.f32.vlgmr.msra.gmra.mrb[0].mxu1 %v48_v33  ;;  %669 = vmatpush3.bf16.msra.mxu0 %v668_v42  ;;  %v372_v33 = vld [vmem:[#allocation4 + $0x1d8] sm:$0xff]  ;;  %v323_v36 = vld [vmem:[#allocation4 + $0x50] sm:$0xff]  ;;  %v342_v42 = vld [vmem:[#allocation4 + $0xe8] sm:$0xff] }
  0x4c   :  { %701 = vmatpush3.bf16.msra.mxu1 %v700_v45  ;;  %671 = vmatprep.subr.bf16.mxu0 %v670_v49  ;;  %v718_v35 = vpack.c.bf16 %v372_v33, %v371_v32  ;;  %v355_v38 = vld [vmem:[#allocation4 + $0x150] sm:$0xff]  ;;  %v688_v39 = vpack.c.bf16 %v324_v37, %v323_v36  ;;  %v356_v40 = vld [vmem:[#allocation4 + $0x158] sm:$0xff]  ;;  %v690_v44 = vpack.c.bf16 %v342_v42, %v341_v41  ;;  %v373_v45 = vld [vmem:[#allocation4 + $0x1e0] sm:$0xff] }
  0x4d   :  { %703 = vmatprep.subr.bf16.mxu1 %v702_v53  ;;  %v720_v43 = vpack.c.bf16 %v356_v40, %v355_v38  ;;  %v374_v46 = vld [vmem:[#allocation4 + $0x1e8] sm:$0xff]  ;;  %v325_v47 = vld [vmem:[#allocation4 + $0x60] sm:$0xff]  ;;  %v343_v53 = vld [vmem:[#allocation4 + $0xf0] sm:$0xff] }
  0x4e   :  { %v722_v48 = vpack.c.bf16 %v374_v46, %v373_v45  ;;  %v326_v49 = vld [vmem:[#allocation4 + $0x68] sm:$0xff]  ;;  %v357_v50 = vld [vmem:[#allocation4 + $0x160] sm:$0xff]  ;;  %v375_v55 = vld [vmem:[#allocation4 + $0x1f0] sm:$0xff] }
  0x4f   :  { %673 = vmatpush3.bf16.msra.mxu0 %v672_v54  ;;  %v358_v51 = vld [vmem:[#allocation4 + $0x168] sm:$0xff]  ;;  %v692_v52 = vpack.c.bf16 %v326_v49, %v325_v47  ;;  %v344_v54 = vld [vmem:[#allocation4 + $0xf8] sm:$0xff]  ;;  %v327_v59 = vld [vmem:[#allocation4 + $0x70] sm:$0xff] }
  0x50   :  { %705 = vmatpush3.bf16.msra.mxu1 %v704_v57  ;;  %675 = vmatprep.subr.bf16.mxu0 %v674_v61  ;;  %v724_v56 = vpack.c.bf16 %v358_v51, %v357_v50  ;;  %v694_v57 = vpack.c.bf16 %v344_v54, %v343_v53  ;;  %v376_v58 = vld [vmem:[#allocation4 + $0x1f8] sm:$0xff]  ;;  %v359_v62 = vld [vmem:[#allocation4 + $0x170] sm:$0xff] }
  0x51   :  { %707 = vmatprep.subr.bf16.mxu1 %v706_v1  ;;  %v328_v60 = vld [vmem:[#allocation4 + $0x78] sm:$0xff]  ;;  %v726_v61 = vpack.c.bf16 %v376_v58, %v375_v55 }
  0x52   :  { %v360_v63 = vld [vmem:[#allocation4 + $0x178] sm:$0xff]  ;;  %v696_v0 = vpack.c.bf16 %v328_v60, %v327_v59  ;;  %v531_v59 = vld [vmem:[%s870_s4] ss:$0 sm:$0xff] }
  0x53   :  { %677 = vmatpush3.bf16.msra.mxu0 %v676_v2  ;;  %v728_v1 = vpack.c.bf16 %v360_v63, %v359_v62  ;;  %v115_v2 = vlaneseq }
  0x54   :  { %709 = vmatpush3.bf16.msra.mxu1 %v708_v5  ;;  %679 = vmatprep.subr.bf16.mxu0 %v678_v9  ;;  %v113_v5 = vld [vmem:[%s868_s2] sm:$0xf] }
  0x55   :  { %711 = vmatprep.subr.bf16.mxu1 %v710_v13  ;;  %v116_v3 = vshrl.u32 %v115_v2, 7 }
  0x57   :  { %681 = vmatpush3.bf16.msra.mxu0 %v680_v14  ;;  %v117_v4 = vsub.s32 0, %v116_v3  ;;  %v125_v6 = vsub.s32 2, %v116_v3  ;;  %v121_v7 = vsub.s32 1, %v116_v3  ;;  %v129_v8 = vsub.s32 3, %v116_v3 }
  0x58   :  { %713 = vmatpush3.bf16.msra.mxu1 %v712_v17  ;;  %683 = vmatprep.subr.bf16.mxu0 %v682_v21 }
  0x59   :  { %715 = vmatprep.subr.bf16.mxu1 %v714_v25  ;;  %v118_v9 = vrot.slane %v113_v5, %v117_v4  ;;  %v126_v10 = vrot.slane %v113_v5, %v125_v6  ;;  %v122_v11 = vrot.slane %v113_v5, %v121_v7  ;;  %v130_v12 = vrot.slane %v113_v5, %v129_v8 }
  0x5b   :  { %685 = vmatpush3.bf16.msra.mxu0 %v684_v26 }
  0x5c   :  { %717 = vmatpush3.bf16.msra.mxu1 %v716_v30  ;;  %687 = vmatprep.subr.bf16.mxu0 %v686_v34 }
  0x5d   :  { %719 = vmatprep.subr.bf16.mxu1 %v718_v35 }
  0x5f   :  { %689 = vmatpush3.bf16.msra.mxu0 %v688_v39 }
  0x60   :  { %721 = vmatpush3.bf16.msra.mxu1 %v720_v43  ;;  %691 = vmatprep.subr.bf16.mxu0 %v690_v44 }
  0x61   :  { %723 = vmatprep.subr.bf16.mxu1 %v722_v48 }
  0x63   :  { %693 = vmatpush3.bf16.msra.mxu0 %v692_v52 }
  0x64   :  { %725 = vmatpush3.bf16.msra.mxu1 %v724_v56  ;;  %695 = vmatprep.subr.bf16.mxu0 %v694_v57 }
  0x65   :  { %727 = vmatprep.subr.bf16.mxu1 %v726_v61 }
  0x67   :  { %697 = vmatpush3.bf16.msra.mxu0 %v696_v0 }
  0x68   :  { %729 = vmatpush3.bf16.msra.mxu1 %v728_v1 }
 0x11d   :  { %v201_v13 = vpop.f32.mrb[0].mxu0 }
 0x11e   :  { %v202_v14 = vadd.f32 %v201_v13, %v118_v9  ;;  %v272_v15 = vpop.f32.mrb[0].mxu1  ;;  %v203_v16 = vpop.f32.mrb[1].mxu0 }
 0x11f   :  { %v273_v17 = vadd.f32 %v272_v15, %v126_v10  ;;  %v204_v18 = vadd.f32 %v203_v16, %v122_v11  ;;  %v274_v19 = vpop.f32.mrb[1].mxu1 }
 0x120   :  { %v277_v20 = vmul.f32 %v202_v14, %v202_v14  ;;  %v275_v21 = vadd.f32 %v274_v19, %v130_v12 }
 0x121   :  { %v279_v22 = vmul.f32 %v273_v17, %v273_v17  ;;  %v278_v23 = vmul.f32 %v204_v18, %v204_v18 }
 0x122   :  { %v281_v24 = vmul.f32 %v277_v20, %v202_v14  ;;  %v280_v25 = vmul.f32 %v275_v21, %v275_v21 }
 0x123   :  { %v283_v26 = vmul.f32 %v279_v22, %v273_v17  ;;  %v282_v27 = vmul.f32 %v278_v23, %v204_v18 }
 0x124   :  { %v285_v28 = vmul.f32 0.044715, %v281_v24  ;;  %v284_v29 = vmul.f32 %v280_v25, %v275_v21 }
 0x125   :  { %v287_v30 = vmul.f32 0.044715, %v283_v26  ;;  %v286_v31 = vmul.f32 0.044715, %v282_v27 }
 0x126   :  { %v289_v32 = vadd.f32 %v285_v28, %v202_v14  ;;  %v288_v33 = vmul.f32 0.044715, %v284_v29 }
 0x127   :  { %v291_v34 = vadd.f32 %v287_v30, %v273_v17  ;;  %v290_v35 = vadd.f32 %v286_v31, %v204_v18 }
 0x128   :  { %v293_v36 = vmul.f32 0.7978846, %v289_v32  ;;  %v292_v37 = vadd.f32 %v288_v33, %v275_v21 }
 0x129   :  { %v295_v38 = vmul.f32 0.7978846, %v291_v34  ;;  %v294_v39 = vmul.f32 0.7978846, %v290_v35 }
 0x12a   :  { %737 = vtanh.f32 %v293_v36  ;;  %v296_v40 = vmul.f32 0.7978846, %v292_v37 }
 0x12b   :  { %739 = vtanh.f32 %v295_v38 }
 0x12c   :  { %741 = vtanh.f32 %v294_v39 }
 0x12d   :  { %743 = vtanh.f32 %v296_v40 }
 0x134   :  { %v738_v41 = vpop.eup %737 }
 0x135   :  { %v740_v42 = vpop.eup %739  ;;  %v301_v43 = vadd.f32 1.0, %v738_v41 }
 0x136   :  { %v742_v44 = vpop.eup %741  ;;  %v303_v45 = vadd.f32 1.0, %v740_v42 }
 0x137   :  { %v744_v46 = vpop.eup %743  ;;  %v302_v47 = vadd.f32 1.0, %v742_v44  ;;  %v305_v49 = vmul.f32 0.5, %v301_v43 }
 0x138   :  { %v304_v48 = vadd.f32 1.0, %v744_v46  ;;  %v307_v51 = vmul.f32 0.5, %v303_v45 }
 0x139   :  { %v306_v50 = vmul.f32 0.5, %v302_v47  ;;  %v309_v55 = vmul.f32 %v305_v49, %v202_v14 }
 0x13a   :  { %v308_v52 = vmul.f32 0.5, %v304_v48  ;;  %v311_v56 = vmul.f32 %v307_v51, %v273_v17 }
 0x13b   :  { %v310_v53 = vmul.f32 %v306_v50, %v204_v18 }
 0x13c   :  { %v312_v54 = vmul.f32 %v308_v52, %v275_v21 }
 0x13d   :  { %448 = vmatprep.mubr.f32.mxu0 %v310_v53 }
 0x13e   :  { %518 = vmatprep.mubr.f32.mxu1 %v312_v54  ;;  %449 = vmatmul.mubr.f32.vlgmr.msra.gmra.mrb[2].mxu0 %v309_v55 }
 0x13f   :  { %519 = vmatmul.mubr.f32.vlgmr.msra.gmra.mrb[2].mxu1 %v311_v56 }
 0x211   :  { %v564_v57 = vpop.f32.mrb[2].mxu0 }
 0x212   :  { %v599_v58 = vpop.f32.mrb[2].mxu1  ;;  %v565_v60 = vpop.f32.mrb[3].mxu0 }
 0x213   :  { %v566_v61 = vadd.f32 %v565_v60, %v564_v57  ;;  %v600_v62 = vpop.f32.mrb[3].mxu1 }
 0x214   :  { %v601_v63 = vadd.f32 %v600_v62, %v599_v58 }
 0x215   :  { %v451_v0 = vadd.f32 %v566_v61, %v531_v59 }
 0x217   :  { %v521_v1 = vadd.f32 %v601_v63, %v451_v0 }
 0x219   :  { %524 = vst [vmem:[%s871_s5] sm:$0xf] %v521_v1 }
 0x21a   :  { %529 = vsyncpa [#allocation3], 1 }
 0x21b   :  { %530 = vsyncpa [#allocation5], 1 }

</bundles_post_ra>
